<compile_context>
chip_gen: v6e
topology: v6e:2x2x1
jax: 0.10.0
libtpu: 0.0.40
codegen_flags: <defaults>
</compile_context>

<pallas_src>
import jax
import jax.numpy as jnp
from jax.experimental import pallas as pl
from jax.experimental.pallas import tpu as pltpu


def rnn_forward_kernel(x_ref, w_ih_ref, w_hh_ref, b_ref, w_lin_ref, b_lin_ref,
                       out_ref, h_scratch):
    """One (batch-tile, time-chunk) grid step of the Elman RNN.

    x_ref:     [Tt, Bt, E]  embedded input chunk (time-major)
    w_ih_ref:  [E, H]       input->hidden weight (transposed vs. PyTorch)
    w_hh_ref:  [H, H]       hidden->hidden weight (transposed vs. PyTorch)
    b_ref:     [1, H]       pre-summed bias (b_ih + b_hh)
    w_lin_ref: [1, H]       linear head weight as a row
    b_lin_ref: [1, 1]       linear head bias (SMEM)
    out_ref:   [Bt, 1]      sigmoid output for this batch tile
    h_scratch: [Bt, H]      recurrent hidden state, persists across time chunks
    """
    t_chunk, b_tile, E = x_ref.shape
    H = w_hh_ref.shape[0]
    t_idx = pl.program_id(1)

    # h_0 = 0 (PyTorch nn.RNN default).  Must only run on the first time chunk of
    # each batch tile (time is the innermost grid axis, so it resets per batch tile).
    @pl.when(t_idx == 0)
    def _init():
        h_scratch[...] = jnp.zeros_like(h_scratch)

    # Hoisted input projection: one dense matmul for the whole chunk + a single
    # broadcast of the pre-summed bias.  No serial dependency -> real MXU utilization.
    x_flat = x_ref[...].reshape(t_chunk * b_tile, E)                    # [Tt*Bt, E]
    x_proj = (jnp.dot(x_flat, w_ih_ref[...],
                      preferred_element_type=jnp.float32) + b_ref[...])  # [Tt*Bt, H]
    x_proj = x_proj.reshape(t_chunk, b_tile, H)                          # [Tt, Bt, H]

    # Serial recurrence, statically unrolled, h carried in registers.
    w_hh = w_hh_ref[...]
    h = h_scratch[...]
    for t in range(t_chunk):
        h = jnp.tanh(x_proj[t]
                     + jnp.dot(h, w_hh, preferred_element_type=jnp.float32))
    h_scratch[...] = h

    # Linear head + sigmoid only on the last time chunk (x[:, -1, :] in PyTorch).
    # TODO(synk): dropout is identity at inference (eval mode); training-mode masking
    #             is not implemented here.
    @pl.when(t_idx == pl.num_programs(1) - 1)
    def _head():
        # out-dim == 1: VPU multiply + lane reduction instead of an N=1 MXU matmul.
        logits = jnp.sum(h * w_lin_ref[...], axis=-1, keepdims=True) + b_lin_ref[0, 0]
        out_ref[...] = jax.nn.sigmoid(logits)


def rnn_pallas(x_tbe, w_ih, w_hh, b_sum, w_lin_row, b_lin, *, t_chunk=8, b_tile=8):
    T, B, E = x_tbe.shape
    H = w_hh.shape[0]
    assert T % t_chunk == 0, (T, t_chunk)
    assert B % b_tile == 0, (B, b_tile)
    n_b = B // b_tile
    n_t = T // t_chunk

    return pl.pallas_call(
        rnn_forward_kernel,
        out_shape=jax.ShapeDtypeStruct((B, 1), jnp.float32),
        grid_spec=pltpu.PrefetchScalarGridSpec(
            num_scalar_prefetch=0,
            grid=(n_b, n_t),                       # batch tiles outer, time chunks inner
            in_specs=[
                pl.BlockSpec((t_chunk, b_tile, E), lambda b, t: (t, b, 0)),   # x chunk
                pl.BlockSpec((E, H), lambda b, t: (0, 0)),                    # W_ih
                pl.BlockSpec((H, H), lambda b, t: (0, 0)),                    # W_hh
                pl.BlockSpec((1, H), lambda b, t: (0, 0)),                    # b_ih + b_hh
                pl.BlockSpec((1, H), lambda b, t: (0, 0)),                    # W_lin row
                pl.BlockSpec(memory_space=pltpu.MemorySpace.SMEM),            # b_lin
            ],
            out_specs=pl.BlockSpec((b_tile, 1), lambda b, t: (b, 0)),
            scratch_shapes=[pltpu.VMEM((b_tile, H), jnp.float32)],
        ),
        compiler_params=pltpu.CompilerParams(
            dimension_semantics=("parallel", "arbitrary")),
    )(x_tbe, w_ih, w_hh, b_sum, w_lin_row, b_lin)


def rnn_model_forward(token_ids, emb_table, w_ih, w_hh, b_ih, b_hh, w_lin, b_lin,
                      *, t_chunk=8, b_tile=8):
    """token_ids: [B, T] int32 (batch_first, like the torchtext Field).

    Embedding lookup + layout plumbing are glue (plain JAX); the recurrence, matmuls
    and sigmoid head run inside the Pallas kernel.
    """
    x_emb = jnp.take(emb_table, token_ids, axis=0)      # [B, T, E]
    x_tbe = jnp.transpose(x_emb, (1, 0, 2))             # [T, B, E] time-major
    b_sum = (b_ih + b_hh).reshape(1, -1)                 # pre-sum biases -> one kernel arg
    w_lin_row = jnp.transpose(w_lin)                     # [1, H]
    return rnn_pallas(x_tbe, w_ih, w_hh, b_sum, w_lin_row, b_lin,
                      t_chunk=t_chunk, b_tile=b_tile)


def reference_forward(token_ids, emb_table, w_ih, w_hh, b_ih, b_hh, w_lin, b_lin):
    """Pure-JAX reference mirroring the PyTorch forward (eval mode)."""
    x = jnp.take(emb_table, token_ids, axis=0)           # [B, T, E]
    B, T, E = x.shape
    H = w_hh.shape[0]
    h = jnp.zeros((B, H), jnp.float32)
    for t in range(T):
        h = jnp.tanh(x[:, t, :] @ w_ih + h @ w_hh + b_ih + b_hh)
    return jax.nn.sigmoid(h @ w_lin + b_lin)


if __name__ == "__main__":
    # Small but hardware-aligned sizes: E = H = 128 (lane), B multiple of 8 (sublane).
    vocab_size = 100
    embedding_dim = 128   # matches the module spec (embedding_dim = 128)
    hidden_size = 128     # nn.RNN(embedding_dim, hidden_size, batch_first=True)
    out_dim = 1           # nn.Linear(hidden_size, 1)
    batch, seq = 8, 16
    t_chunk, b_tile = 8, 8

    key = jax.random.PRNGKey(0)
    ks = jax.random.split(key, 8)

    emb_table = jax.random.normal(ks[0], (vocab_size, embedding_dim), jnp.float32) * 0.1
    # Stored pre-transposed for the kernel: y = x @ W with W as [in, out].
    w_ih = jax.random.normal(ks[1], (embedding_dim, hidden_size), jnp.float32) * 0.1
    w_hh = jax.random.normal(ks[2], (hidden_size, hidden_size), jnp.float32) * 0.1
    b_ih = jax.random.normal(ks[3], (1, hidden_size), jnp.float32) * 0.1
    b_hh = jax.random.normal(ks[4], (1, hidden_size), jnp.float32) * 0.1
    w_lin = jax.random.normal(ks[5], (hidden_size, out_dim), jnp.float32) * 0.1
    b_lin = jax.random.normal(ks[6], (1, out_dim), jnp.float32) * 0.1

    token_ids = jax.random.randint(ks[7], (batch, seq), 0, vocab_size, jnp.int32)

    y = rnn_model_forward(token_ids, emb_table, w_ih, w_hh, b_ih, b_hh, w_lin, b_lin,
                          t_chunk=t_chunk, b_tile=b_tile)
    y = jax.block_until_ready(y)

    y_ref = reference_forward(token_ids, emb_table, w_ih, w_hh, b_ih, b_hh, w_lin, b_lin)
    assert y.shape == (batch, 1), y.shape
    assert jnp.allclose(y, y_ref, atol=1e-5, rtol=1e-5), (y, y_ref)

    print("KERNEL_OK")
</pallas_src>

<mosaic_0001>
module attributes {stable_mosaic.version = 11 : i64} {
  func.func @rnn_forward_kernel(%arg0: i32, %arg1: i32, %arg2: memref<8x8x128xf32, #tpu.memory_space<vmem>>, %arg3: memref<128x128xf32, #tpu.memory_space<vmem>>, %arg4: memref<128x128xf32, #tpu.memory_space<vmem>>, %arg5: memref<1x128xf32, #tpu.memory_space<vmem>>, %arg6: memref<1x128xf32, #tpu.memory_space<vmem>>, %arg7: memref<1x1xf32, #tpu.memory_space<smem>>, %arg8: memref<8x1xf32, #tpu.memory_space<vmem>>, %arg9: memref<8x128xf32, #tpu.memory_space<vmem>>) attributes {dimension_semantics = [#tpu.dimension_semantics<parallel>, #tpu.dimension_semantics<arbitrary>], iteration_bounds = array<i64: 1, 2>, scalar_prefetch = 0 : i64, scratch_operands = 1 : i64, tpu.core_type = #tpu.core_type<tc>, window_params = [{transform_indices = @transform_0, window_bounds = array<i64: 8, 8, 128>}, {pipeline_mode = #tpu.pipeline_mode<synchronous>, transform_indices = @transform_1, window_bounds = array<i64: 128, 128>}, {pipeline_mode = #tpu.pipeline_mode<synchronous>, transform_indices = @transform_2, window_bounds = array<i64: 128, 128>}, {pipeline_mode = #tpu.pipeline_mode<synchronous>, transform_indices = @transform_3, window_bounds = array<i64: 1, 128>}, {pipeline_mode = #tpu.pipeline_mode<synchronous>, transform_indices = @transform_4, window_bounds = array<i64: 1, 128>}, {transform_indices = @transform_5, window_bounds = array<i64: 1, 1>}, {transform_indices = @transform_6, window_bounds = array<i64: 8, 1>}]} {
    %c0_i32 = arith.constant 0 : i32
    %0 = arith.cmpi eq, %arg1, %c0_i32 : i32
    %1 = arith.extui %0 : i1 to i32
    %c0_i32_0 = arith.constant 0 : i32
    %2 = arith.cmpi ne, %1, %c0_i32_0 : i32
    scf.if %2 {
      %cst_22 = arith.constant 0.000000e+00 : f32
      %57 = vector.broadcast %cst_22 : f32 to vector<8x128xf32>
      %c0_23 = arith.constant 0 : index
      %c0_24 = arith.constant 0 : index
      %58 = vector.load %arg9[%c0_23, %c0_24] : memref<8x128xf32, #tpu.memory_space<vmem>>, vector<8x128xf32>
      tpu.vector_store %arg9[%c0_23, %c0_24], %57 {strides = array<i32>} : memref<8x128xf32, #tpu.memory_space<vmem>>, vector<8x128xf32>,
    } else {
    }
    %c0 = arith.constant 0 : index
    %c0_1 = arith.constant 0 : index
    %c0_2 = arith.constant 0 : index
    %3 = vector.load %arg2[%c0, %c0_1, %c0_2] : memref<8x8x128xf32, #tpu.memory_space<vmem>>, vector<8x8x128xf32>
    %4 = vector.shape_cast %3 : vector<8x8x128xf32> to vector<64x128xf32>
    %c0_3 = arith.constant 0 : index
    %c0_4 = arith.constant 0 : index
    %5 = vector.load %arg3[%c0_3, %c0_4] : memref<128x128xf32, #tpu.memory_space<vmem>>, vector<128x128xf32>
    %cst = arith.constant dense<0.000000e+00> : vector<64x128xf32>
    %6 = tpu.matmul %4, %5, %cst {dimension_numbers = #tpu.dot_dimension_numbers<[1], [0], [0], [1], [0, 0, 1, 1], [], []>} : vector<64x128xf32>, vector<128x128xf32>, vector<64x128xf32> -> vector<64x128xf32>
    %c0_5 = arith.constant 0 : index
    %c0_6 = arith.constant 0 : index
    %7 = vector.load %arg5[%c0_5, %c0_6] : memref<1x128xf32, #tpu.memory_space<vmem>>, vector<1x128xf32>
    %8 = vector.broadcast %7 : vector<1x128xf32> to vector<64x128xf32>
    %9 = arith.addf %6, %8 : vector<64x128xf32>
    %10 = vector.shape_cast %9 : vector<64x128xf32> to vector<8x8x128xf32>
    %c0_7 = arith.constant 0 : index
    %c0_8 = arith.constant 0 : index
    %11 = vector.load %arg4[%c0_7, %c0_8] : memref<128x128xf32, #tpu.memory_space<vmem>>, vector<128x128xf32>
    %c0_9 = arith.constant 0 : index
    %c0_10 = arith.constant 0 : index
    %12 = vector.load %arg9[%c0_9, %c0_10] : memref<8x128xf32, #tpu.memory_space<vmem>>, vector<8x128xf32>
    %13 = vector.extract_strided_slice %10 {offsets = [0, 0, 0], sizes = [1, 8, 128], strides = [1, 1, 1]} : vector<8x8x128xf32> to vector<1x8x128xf32>
    %14 = vector.shape_cast %13 : vector<1x8x128xf32> to vector<8x128xf32>
    %cst_11 = arith.constant dense<0.000000e+00> : vector<8x128xf32>
    %15 = tpu.matmul %12, %11, %cst_11 {dimension_numbers = #tpu.dot_dimension_numbers<[1], [0], [0], [1], [0, 0, 1, 1], [], []>} : vector<8x128xf32>, vector<128x128xf32>, vector<8x128xf32> -> vector<8x128xf32>
    %16 = arith.addf %14, %15 : vector<8x128xf32>
    %17 = math.tanh %16 : vector<8x128xf32>
    %18 = vector.extract_strided_slice %10 {offsets = [1, 0, 0], sizes = [1, 8, 128], strides = [1, 1, 1]} : vector<8x8x128xf32> to vector<1x8x128xf32>
    %19 = vector.shape_cast %18 : vector<1x8x128xf32> to vector<8x128xf32>
    %cst_12 = arith.constant dense<0.000000e+00> : vector<8x128xf32>
    %20 = tpu.matmul %17, %11, %cst_12 {dimension_numbers = #tpu.dot_dimension_numbers<[1], [0], [0], [1], [0, 0, 1, 1], [], []>} : vector<8x128xf32>, vector<128x128xf32>, vector<8x128xf32> -> vector<8x128xf32>
    %21 = arith.addf %19, %20 : vector<8x128xf32>
    %22 = math.tanh %21 : vector<8x128xf32>
    %23 = vector.extract_strided_slice %10 {offsets = [2, 0, 0], sizes = [1, 8, 128], strides = [1, 1, 1]} : vector<8x8x128xf32> to vector<1x8x128xf32>
    %24 = vector.shape_cast %23 : vector<1x8x128xf32> to vector<8x128xf32>
    %cst_13 = arith.constant dense<0.000000e+00> : vector<8x128xf32>
    %25 = tpu.matmul %22, %11, %cst_13 {dimension_numbers = #tpu.dot_dimension_numbers<[1], [0], [0], [1], [0, 0, 1, 1], [], []>} : vector<8x128xf32>, vector<128x128xf32>, vector<8x128xf32> -> vector<8x128xf32>
    %26 = arith.addf %24, %25 : vector<8x128xf32>
    %27 = math.tanh %26 : vector<8x128xf32>
    %28 = vector.extract_strided_slice %10 {offsets = [3, 0, 0], sizes = [1, 8, 128], strides = [1, 1, 1]} : vector<8x8x128xf32> to vector<1x8x128xf32>
    %29 = vector.shape_cast %28 : vector<1x8x128xf32> to vector<8x128xf32>
    %cst_14 = arith.constant dense<0.000000e+00> : vector<8x128xf32>
    %30 = tpu.matmul %27, %11, %cst_14 {dimension_numbers = #tpu.dot_dimension_numbers<[1], [0], [0], [1], [0, 0, 1, 1], [], []>} : vector<8x128xf32>, vector<128x128xf32>, vector<8x128xf32> -> vector<8x128xf32>
    %31 = arith.addf %29, %30 : vector<8x128xf32>
    %32 = math.tanh %31 : vector<8x128xf32>
    %33 = vector.extract_strided_slice %10 {offsets = [4, 0, 0], sizes = [1, 8, 128], strides = [1, 1, 1]} : vector<8x8x128xf32> to vector<1x8x128xf32>
    %34 = vector.shape_cast %33 : vector<1x8x128xf32> to vector<8x128xf32>
    %cst_15 = arith.constant dense<0.000000e+00> : vector<8x128xf32>
    %35 = tpu.matmul %32, %11, %cst_15 {dimension_numbers = #tpu.dot_dimension_numbers<[1], [0], [0], [1], [0, 0, 1, 1], [], []>} : vector<8x128xf32>, vector<128x128xf32>, vector<8x128xf32> -> vector<8x128xf32>
    %36 = arith.addf %34, %35 : vector<8x128xf32>
    %37 = math.tanh %36 : vector<8x128xf32>
    %38 = vector.extract_strided_slice %10 {offsets = [5, 0, 0], sizes = [1, 8, 128], strides = [1, 1, 1]} : vector<8x8x128xf32> to vector<1x8x128xf32>
    %39 = vector.shape_cast %38 : vector<1x8x128xf32> to vector<8x128xf32>
    %cst_16 = arith.constant dense<0.000000e+00> : vector<8x128xf32>
    %40 = tpu.matmul %37, %11, %cst_16 {dimension_numbers = #tpu.dot_dimension_numbers<[1], [0], [0], [1], [0, 0, 1, 1], [], []>} : vector<8x128xf32>, vector<128x128xf32>, vector<8x128xf32> -> vector<8x128xf32>
    %41 = arith.addf %39, %40 : vector<8x128xf32>
    %42 = math.tanh %41 : vector<8x128xf32>
    %43 = vector.extract_strided_slice %10 {offsets = [6, 0, 0], sizes = [1, 8, 128], strides = [1, 1, 1]} : vector<8x8x128xf32> to vector<1x8x128xf32>
    %44 = vector.shape_cast %43 : vector<1x8x128xf32> to vector<8x128xf32>
    %cst_17 = arith.constant dense<0.000000e+00> : vector<8x128xf32>
    %45 = tpu.matmul %42, %11, %cst_17 {dimension_numbers = #tpu.dot_dimension_numbers<[1], [0], [0], [1], [0, 0, 1, 1], [], []>} : vector<8x128xf32>, vector<128x128xf32>, vector<8x128xf32> -> vector<8x128xf32>
    %46 = arith.addf %44, %45 : vector<8x128xf32>
    %47 = math.tanh %46 : vector<8x128xf32>
    %48 = vector.extract_strided_slice %10 {offsets = [7, 0, 0], sizes = [1, 8, 128], strides = [1, 1, 1]} : vector<8x8x128xf32> to vector<1x8x128xf32>
    %49 = vector.shape_cast %48 : vector<1x8x128xf32> to vector<8x128xf32>
    %cst_18 = arith.constant dense<0.000000e+00> : vector<8x128xf32>
    %50 = tpu.matmul %47, %11, %cst_18 {dimension_numbers = #tpu.dot_dimension_numbers<[1], [0], [0], [1], [0, 0, 1, 1], [], []>} : vector<8x128xf32>, vector<128x128xf32>, vector<8x128xf32> -> vector<8x128xf32>
    %51 = arith.addf %49, %50 : vector<8x128xf32>
    %52 = math.tanh %51 : vector<8x128xf32>
    %c0_19 = arith.constant 0 : index
    %c0_20 = arith.constant 0 : index
    %53 = vector.load %arg9[%c0_19, %c0_20] : memref<8x128xf32, #tpu.memory_space<vmem>>, vector<8x128xf32>
    tpu.vector_store %arg9[%c0_19, %c0_20], %52 {strides = array<i32>} : memref<8x128xf32, #tpu.memory_space<vmem>>, vector<8x128xf32>,
    %c1_i32 = arith.constant 1 : i32
    %54 = arith.cmpi eq, %arg1, %c1_i32 : i32
    %55 = arith.extui %54 : i1 to i32
    %c0_i32_21 = arith.constant 0 : i32
    %56 = arith.cmpi ne, %55, %c0_i32_21 : i32
    scf.if %56 {
      %c0_22 = arith.constant 0 : index
      %c0_23 = arith.constant 0 : index
      %57 = vector.load %arg6[%c0_22, %c0_23] : memref<1x128xf32, #tpu.memory_space<vmem>>, vector<1x128xf32>
      %58 = vector.broadcast %57 : vector<1x128xf32> to vector<8x128xf32>
      %59 = arith.mulf %52, %58 : vector<8x128xf32>
      %cst_24 = arith.constant dense<0.000000e+00> : vector<8xf32>
      %60 = vector.multi_reduction <add>, %59, %cst_24 [1] : vector<8x128xf32> to vector<8xf32>
      %61 = vector.shape_cast %60 : vector<8xf32> to vector<8x1xf32>
      %c0_25 = arith.constant 0 : index
      %c0_26 = arith.constant 0 : index
      %62 = memref.load %arg7[%c0_25, %c0_26] : memref<1x1xf32, #tpu.memory_space<smem>>
      %63 = vector.broadcast %62 : f32 to vector<8x1xf32>
      %64 = arith.addf %61, %63 : vector<8x1xf32>
      %65 = arith.negf %64 : vector<8x1xf32>
      %66 = math.exp %65 : vector<8x1xf32>
      %cst_27 = arith.constant 1.000000e+00 : f32
      %67 = vector.broadcast %cst_27 : f32 to vector<8x1xf32>
      %68 = arith.addf %67, %66 : vector<8x1xf32>
      %69 = arith.divf %67, %68 : vector<8x1xf32>
      %c0_28 = arith.constant 0 : index
      %c0_29 = arith.constant 0 : index
      %70 = vector.load %arg8[%c0_28, %c0_29] : memref<8x1xf32, #tpu.memory_space<vmem>>, vector<8x1xf32>
      tpu.vector_store %arg8[%c0_28, %c0_29], %69 {strides = array<i32>} : memref<8x1xf32, #tpu.memory_space<vmem>>, vector<8x1xf32>,
    } else {
    }
    return
  }
  func.func @transform_0(%arg0: i32, %arg1: i32) -> (i32, i32, i32) {
    %c0_i32 = arith.constant 0 : i32
    %c0_i32_0 = arith.constant 0 : i32
    return %arg1, %arg0, %c0_i32 : i32, i32, i32
  }
  func.func @transform_1(%arg0: i32, %arg1: i32) -> (i32, i32) {
    %c0_i32 = arith.constant 0 : i32
    %c0_i32_0 = arith.constant 0 : i32
    %c0_i32_1 = arith.constant 0 : i32
    return %c0_i32, %c0_i32_0 : i32, i32
  }
  func.func @transform_2(%arg0: i32, %arg1: i32) -> (i32, i32) {
    %c0_i32 = arith.constant 0 : i32
    %c0_i32_0 = arith.constant 0 : i32
    %c0_i32_1 = arith.constant 0 : i32
    return %c0_i32, %c0_i32_0 : i32, i32
  }
  func.func @transform_3(%arg0: i32, %arg1: i32) -> (i32, i32) {
    %c0_i32 = arith.constant 0 : i32
    %c0_i32_0 = arith.constant 0 : i32
    %c0_i32_1 = arith.constant 0 : i32
    return %c0_i32, %c0_i32_0 : i32, i32
  }
  func.func @transform_4(%arg0: i32, %arg1: i32) -> (i32, i32) {
    %c0_i32 = arith.constant 0 : i32
    %c0_i32_0 = arith.constant 0 : i32
    %c0_i32_1 = arith.constant 0 : i32
    return %c0_i32, %c0_i32_0 : i32, i32
  }
  func.func @transform_5(%arg0: i32, %arg1: i32) -> (i32, i32) {
    %c0_i32 = arith.constant 0 : i32
    %c0_i32_0 = arith.constant 0 : i32
    %c0_i32_1 = arith.constant 0 : i32
    return %c0_i32, %c0_i32_0 : i32, i32
  }
  func.func @transform_6(%arg0: i32, %arg1: i32) -> (i32, i32) {
    %c0_i32 = arith.constant 0 : i32
    %c0_i32_0 = arith.constant 0 : i32
    return %arg0, %c0_i32 : i32, i32
  }
}

</mosaic_0001>

<bundles_post_ra>
// kernel: tpu_custom_call.1
= control target key start
LH: loop header
LB: loop body
LE: loop exit
PB: predicated region body
PF: predicated region fallthrough
CT: control target
= control target key end

     0   :  { %s2443_s0 = inlined_call_operand.hbm [shape: f32[16,8,128], index: 0, kind: input, shape index: {}]   ;;  %s2444_s1 = inlined_call_operand.hbm [shape: f32[128,128], index: 1, kind: input, shape index: {}]   ;;  %s2445_s2 = inlined_call_operand.hbm [shape: f32[128,128], index: 2, kind: input, shape index: {}]   ;;  %s2446_s3 = inlined_call_operand.vmem [shape: f32[1,128], index: 3, kind: input, shape index: {}]   ;;  %s2447_s4 = inlined_call_operand.vmem [shape: f32[1,128], index: 4, kind: input, shape index: {}]   ;;  %s2448_s5 = inlined_call_operand.<no memory space> [shape: f32[1,1], index: 5, kind: input, shape index: {}]   ;;  %s2449_s6 = inlined_call_operand.vmem [shape: f32[8,1], index: 6, kind: output, shape index: {}]  }
   0x1   :  { %11 = sst [smem:[#allocation3]] %s2448_s5 }
   0x2   :  { %12 = vsyncpa [#allocation5], 0 }
   0x3   :  { %14 = vsyncpa [#allocation5 + $0x1], 0 }
   0x4   :  { %15 = vsyncpa [#allocation7], 0  ;;  %s1955_s23 = smov 0   ;;  %s1957_s24 = smov 0  }
   0x5   :  { %s1959_s25 = smov 0   ;;  %s1961_s26 = smov 0  }
   0x6   :  { %s1963_s27 = smov 0   ;;  %s1965_s28 = smov 0  }
   0x7 LB: > { %s1167_s5 = sadd.s32 4294967295, %s1907_s28   ;;  %p55_p0 = scmp.ne.s32.totalorder %s1891_s24, %s1887_s23  ;;  %s1907_s28 = sphi %s1965_s28, %s21_s28   ;;  %s1903_s27 = sphi %s1963_s27, %s2459_s27   ;;  %s1899_s26 = sphi %s1961_s26, %s2458_s26   ;;  %s1895_s25 = sphi %s1959_s25, %s2457_s25   ;;  %s1891_s24 = sphi %s1957_s24, %s2456_s24   ;;  %s1887_s23 = sphi %s1955_s23, %s2455_s23  }
   0x8   : > { %p1985_p1 = scmp.eq.s32.totalorder %s1167_s5, 0  ;;  %p1168_p2 = scmp.ge.s32.totalorder %s1907_s28, 1 }
   0x9   : > { %p197_p3 = scmp.lt.s32.totalorder %s1907_s28, 3  ;;  %s1909_s8 = smov [#allocation6]  }
   0xa   : > { %p1993_p4 = por %p1985_p1, %p55_p0  ;;  %s209_s9 = sshll.u32 %s1909_s8, 4  ;;  %s210_s9 = int_to_ptr.vmem [resolvable:$true] %s209_s9 }
   0xb   : > { %p1997_p5 = pnand %p1168_p2, %p197_p3  ;;  %s1910_s11 = smov [#allocation8]  }
   0xc   : > { %s222_s12 = sshll.u32 %s1910_s11, 4  ;;  %s1784_s13 = scalar_lea.vmem %s210_s9, 2048  ;;  %s223_s12 = int_to_ptr.vmem [resolvable:$true] %s222_s12 }
   0xd   : > { %p1682_p6 = pneg %p1997_p5  ;;  %p1785_p9 = scmp.ne.s32.totalorder %s210_s9, %s1784_s13 }
   0xe   : > { %p1792_p12 = scmp.lt.s32.totalorder %s210_s9, %s210_s9  ;;  %p1793_p13 = scmp.lt.s32.totalorder %s1784_s13, %s1784_s13 }
   0xf   : > { %p2005_p7 = pnand %p1682_p6, %p1985_p1 }
  0x10   : > { %p1794_p0 = por %p1793_p13, %p1792_p12 }
  0x11   : > { %p1775_p8 = pneg %p2005_p7 }
  0x13   : > { %p1787_p10 = pnand %p1785_p9, %p1775_p8 }
  0x15   : > { %p1788_p11 = pneg %p1787_p10 }
  0x17   : > { %p1795_p2 = pnand %p1794_p0, %p1788_p11 }
  0x19   : > { %1798 = shalt.err (!%p1795_p2)
}
  0x1a   : > { %s1911_s14 = smov 128   ;;  %s1912_s15 = smov 8  }
  0x1b   : > { %1685 = dma.hbm_to_vmem [thread:$0]  (!%p2005_p7), %s2444_s1, 2048, %s210_s9, [#allocation7], %s1911_s14, %s1911_s14, %s1912_s15  }
  0x1c   : > { %s1810_s18 = scalar_lea.vmem %s223_s12, 2048  ;;  %p1818_p10 = scmp.lt.s32.totalorder %s223_s12, %s223_s12 }
  0x1d   : > { %p1811_p3 = scmp.ne.s32.totalorder %s223_s12, %s1810_s18  ;;  %p1819_p11 = scmp.lt.s32.totalorder %s1810_s18, %s1810_s18 }
  0x1f   : > { %p1813_p6 = pnand %p1811_p3, %p1775_p8  ;;  %p1820_p12 = por %p1819_p11, %p1818_p10 }
  0x21   : > { %p1814_p9 = pneg %p1813_p6 }
  0x23   : > { %p1821_p13 = pnand %p1820_p12, %p1814_p9 }
  0x25   : > { %1824 = shalt.err (!%p1821_p13)
}
  0x26   : > { %1688 = dma.hbm_to_vmem [thread:$0]  (!%p2005_p7), %s2445_s2, 2048, %s223_s12, [#allocation7], %s1911_s14, %s1911_s14, %s1912_s15  }
  0x27   : > { %s30_s21 = sadd.s32 1, %s1903_s27  ;;  %s42_s22 = sadd.s32 1, %s1895_s25 }
  0x28   : > { %p31_p8 = scmp.ge.s32.totalorder %s30_s21, 2  ;;  %p49_p0 = scmp.ne.s32.totalorder %s1895_s25, %s1891_s24 }
  0x29   : > { %p50_p2 = scmp.eq.s32.totalorder %s1907_s28, 0  ;;  %p1695_p3 = scmp.lt.s32.totalorder %s1907_s28, 2 }
  0x2a   : > { %s2461_s21 = smov (%p31_p8, %s30_s21), 0  ;;  %s245_s23 = sand.u32 1, %s1895_s25  }
  0x2b   : > { %p51_p6 = por %p50_p2, %p49_p0  ;;  %s37_s5 = ssub.s32 %s1903_s27, %s2461_s21 }
  0x2c   : > { %p40_p9 = scmp.eq.s32.totalorder %s37_s5, 0  ;;  %s1172_s8 = sshll.u32 %s245_s23, 6 }
  0x2d   : > { %s1187_s9 = sshll.u32 %s1903_s27, 10  ;;  %s249_s16 = scalar_lea.vmem [#allocation4], %s1172_s8 }
  0x2e   : > { %s2046_s10 = scalar_select %p40_p9, %s1895_s25, %s42_s22  }
  0x2f   : > { %s256_s13 = scalar_lea.hbm %s2443_s0, %s1187_s9  ;;  %s257_s17 = sshll.u32 %s249_s16, 4  ;;  %s258_s17 = int_to_ptr.vmem [resolvable:$true] %s257_s17 }
  0x30   : > { %p2053_p7 = pnand %p1695_p3, %p51_p6  ;;  %s246_s19 = scalar_lea.sflag [#allocation5], %s245_s23 }
  0x31   : > { %s1838_s20 = scalar_lea.vmem %s258_s17, 1024  ;;  %s1913_s22 = smov [#allocation4]  }
  0x32   : > { %p1827_p10 = pneg %p2053_p7  ;;  %p1839_p11 = scmp.ne.s32.totalorder %s258_s17, %s1838_s20 }
  0x33   : > { %s1843_s5 = sshll.u32 %s1913_s22, 4  ;;  %s1844_s5 = int_to_ptr.vmem [resolvable:$false] %s1843_s5 }
  0x34   : > { %p1841_p12 = pnand %p1839_p11, %p1827_p10  ;;  %s1845_s9 = scalar_lea.vmem %s1844_s5, 2048 }
  0x35   : > { %p1846_p8 = scmp.lt.s32.totalorder %s258_s17, %s1844_s5  ;;  %p1847_p0 = scmp.lt.s32.totalorder %s1845_s9, %s1838_s20 }
  0x36   : > { %p1842_p13 = pneg %p1841_p12 }
  0x37   : > { %p1848_p2 = por %p1847_p0, %p1846_p8 }
  0x39   : > { %p1849_p9 = pnand %p1848_p2, %p1842_p13 }
  0x3b   : > { %1852 = shalt.err (!%p1849_p9)
}
  0x3c   : > { %1692 = dma.hbm_to_vmem [thread:$0]  (!%p2053_p7), %s256_s13, 1024, %s258_s17, %s246_s19, %s1911_s14, %s1911_s14, %s1912_s15  }
  0x3d   : > { %269 = sbr.rel (%p1997_p5) target bundleno = 1964 (0x7ac), region = 44  ;;  %s271_s23 = sand.u32 (!%p1997_p5), 1, %s1891_s24  }
  0x3e   : > { %s1176_s8 = sshll.u32 (!%p1997_p5), %s271_s23, 6  ;;  %s272_s11 = scalar_lea.sflag (!%p1997_p5), [#allocation5], %s271_s23 }
  0x3f   : > { %s2067_s12 = scalar_lea.vmem (!%p1997_p5), [#allocation4], %s1176_s8 }
  0x42   : > { %1878 = dma.done.wait (%p1993_p4), %s272_s11, 1024  }
  0x43   : > { %1880 = vsyncadd (%p1993_p4), %s272_s11, 4294966272 }
  0x44   : > { %1882 = dma.done.wait (%p1985_p1), [#allocation7], 4096  }
  0x45   : > { %1884 = vsyncadd (%p1985_p1), [#allocation7], 4294963200  ;;  %p1179_p5 = scmp.ne.s32.totalorder %s1899_s26, 0 }
  0x47   : > { %319 = sbr.rel (%p1179_p5) target bundleno = 78 (0x4e), region = 60 }
  0x4c   : > { %v1914_v0 = vmov 0.0  }
  0x4d   : > { %320 = vst [vmem:[#allocation2] sm:$0xff] %v1914_v0 }
  0x4e PF: > { %v344_v1 = vld [vmem:[#allocation6 + $0x78] sm:$0xff]  ;;  %v343_v2 = vld [vmem:[#allocation6 + $0x70] sm:$0xff]  ;;  %v1915_v4 = vmov 0.0   ;;  %v342_v6 = vld [vmem:[#allocation6 + $0x68] sm:$0xff]  ;;  %vm1916_vm0 = vmmov 0   ;;  %p1181_p1 = scmp.ne.s32.totalorder %s1899_s26, 1 }
  0x4f   : > { %v2078_v3 = vld [vmem:[#allocation8 + $0x78] sm:$0xff]  ;;  %1348 = vmatprep.subr.mxu0 %v344_v1  ;;  %1392 = vmatprep.subr.mxu1 %v1915_v4  ;;  %v2081_v5 = vld [vmem:[#allocation8 + $0x70] sm:$0xff]  ;;  %v2085_v7 = vld [vmem:[#allocation8 + $0x68] sm:$0xff]  ;;  %s1065_s15 = sld [smem:[#allocation3]] (!%p1181_p1) }
  0x50   : > { %1349 = vmatpush3.msra.mxu0 %v344_v1  ;;  %1393 = vmatpush3.msra.mxu1 %v2078_v3  ;;  %v341_v8 = vld [vmem:[#allocation6 + $0x60] sm:$0xff]  ;;  %v340_v10 = vld [vmem:[#allocation6 + $0x58] sm:$0xff]  ;;  %v339_v12 = vld [vmem:[#allocation6 + $0x50] sm:$0xff] }
  0x51   : > { %1350 = vmatprep.subr.mxu0 %v343_v2  ;;  %1394 = vmatprep.subr.mxu1 %v1915_v4  ;;  %v2089_v9 = vld [vmem:[#allocation8 + $0x60] sm:$0xff]  ;;  %v2093_v11 = vld [vmem:[#allocation8 + $0x58] sm:$0xff]  ;;  %v2097_v13 = vld [vmem:[#allocation8 + $0x50] sm:$0xff] }
  0x52   : > { %1351 = vmatpush3.msra.mxu0 %v343_v2  ;;  %1395 = vmatpush3.msra.mxu1 %v2081_v5  ;;  %v338_v14 = vld [vmem:[#allocation6 + $0x48] sm:$0xff]  ;;  %v337_v16 = vld [vmem:[#allocation6 + $0x40] sm:$0xff]  ;;  %v336_v18 = vld [vmem:[#allocation6 + $0x38] sm:$0xff] }
  0x53   : > { %1352 = vmatprep.subr.mxu0 %v342_v6  ;;  %1396 = vmatprep.subr.mxu1 %v1915_v4  ;;  %v2101_v15 = vld [vmem:[#allocation8 + $0x48] sm:$0xff]  ;;  %v2105_v17 = vld [vmem:[#allocation8 + $0x40] sm:$0xff]  ;;  %v2109_v19 = vld [vmem:[#allocation8 + $0x38] sm:$0xff] }
  0x54   : > { %1353 = vmatpush3.msra.mxu0 %v342_v6  ;;  %1397 = vmatpush3.msra.mxu1 %v2085_v7  ;;  %v335_v20 = vld [vmem:[#allocation6 + $0x30] sm:$0xff]  ;;  %v334_v22 = vld [vmem:[#allocation6 + $0x28] sm:$0xff]  ;;  %v333_v24 = vld [vmem:[#allocation6 + $0x20] sm:$0xff] }
  0x55   : > { %1354 = vmatprep.subr.mxu0 %v341_v8  ;;  %1398 = vmatprep.subr.mxu1 %v1915_v4  ;;  %v2113_v21 = vld [vmem:[#allocation8 + $0x30] sm:$0xff]  ;;  %v2117_v23 = vld [vmem:[#allocation8 + $0x28] sm:$0xff]  ;;  %v2121_v25 = vld [vmem:[#allocation8 + $0x20] sm:$0xff] }
  0x56   : > { %1355 = vmatpush3.msra.mxu0 %v341_v8  ;;  %1399 = vmatpush3.msra.mxu1 %v2089_v9  ;;  %v332_v26 = vld [vmem:[#allocation6 + $0x18] sm:$0xff]  ;;  %v331_v28 = vld [vmem:[#allocation6 + $0x10] sm:$0xff]  ;;  %v330_v30 = vld [vmem:[#allocation6 + $0x8] sm:$0xff] }
  0x57   : > { %1356 = vmatprep.subr.mxu0 %v340_v10  ;;  %1400 = vmatprep.subr.mxu1 %v1915_v4  ;;  %v2125_v27 = vld [vmem:[#allocation8 + $0x18] sm:$0xff]  ;;  %v2129_v29 = vld [vmem:[#allocation8 + $0x10] sm:$0xff]  ;;  %v321_v31 = vld [vmem:[%s2067_s12] sm:$0xff] }
  0x58   : > { %1357 = vmatpush3.msra.mxu0 %v340_v10  ;;  %1401 = vmatpush3.msra.mxu1 %v2093_v11  ;;  %v329_v32 = vld [vmem:[#allocation6] sm:$0xff]  ;;  %v2135_v33 = vld [vmem:[#allocation8 + $0x8] sm:$0xff]  ;;  %v473_v36 = vld [vmem:[#allocation2] sm:$0xff] }
  0x59   : > { %1358 = vmatprep.subr.mxu0 %v339_v12  ;;  %1402 = vmatprep.subr.mxu1 %v1915_v4  ;;  %v322_v34 = vld [vmem:[%s2067_s12 + $0x8] sm:$0xff]  ;;  %v2139_v35 = vld [vmem:[#allocation8] sm:$0xff]  ;;  %v323_v37 = vld [vmem:[%s2067_s12 + $0x10] sm:$0xff] }
  0x5a   : > { %1359 = vmatpush3.msra.mxu0 %v339_v12  ;;  %1403 = vmatpush3.msra.mxu1 %v2097_v13  ;;  %v324_v38 = vld [vmem:[%s2067_s12 + $0x18] sm:$0xff]  ;;  %v325_v39 = vld [vmem:[%s2067_s12 + $0x20] sm:$0xff]  ;;  %v326_v40 = vld [vmem:[%s2067_s12 + $0x28] sm:$0xff] }
  0x5b   : > { %1360 = vmatprep.subr.mxu0 %v338_v14  ;;  %1404 = vmatprep.subr.mxu1 %v1915_v4  ;;  %v327_v41 = vld [vmem:[%s2067_s12 + $0x30] sm:$0xff]  ;;  %v328_v42 = vld [vmem:[%s2067_s12 + $0x38] sm:$0xff] }
  0x5c   : > { %1361 = vmatpush3.msra.mxu0 %v338_v14  ;;  %1405 = vmatpush3.msra.mxu1 %v2101_v15  ;;  %v2225_v44 = vld [vmem:[%s2446_s3] ss:$0 sm:$0xff] }
  0x5d   : > { %1362 = vmatprep.subr.mxu0 %v337_v16  ;;  %1406 = vmatprep.subr.mxu1 %v1915_v4 }
  0x5e   : > { %1363 = vmatpush3.msra.mxu0 %v337_v16  ;;  %1407 = vmatpush3.msra.mxu1 %v2105_v17 }
  0x5f   : > { %1364 = vmatprep.subr.mxu0 %v336_v18  ;;  %1408 = vmatprep.subr.mxu1 %v1915_v4 }
  0x60   : > { %1365 = vmatpush3.msra.mxu0 %v336_v18  ;;  %1409 = vmatpush3.msra.mxu1 %v2109_v19 }
  0x61   : > { %1366 = vmatprep.subr.mxu0 %v335_v20  ;;  %1410 = vmatprep.subr.mxu1 %v1915_v4 }
  0x62   : > { %1367 = vmatpush3.msra.mxu0 %v335_v20  ;;  %1411 = vmatpush3.msra.mxu1 %v2113_v21 }
  0x63   : > { %1368 = vmatprep.subr.mxu0 %v334_v22  ;;  %1412 = vmatprep.subr.mxu1 %v1915_v4 }
  0x64   : > { %1369 = vmatpush3.msra.mxu0 %v334_v22  ;;  %1413 = vmatpush3.msra.mxu1 %v2117_v23 }
  0x65   : > { %1370 = vmatprep.subr.mxu0 %v333_v24  ;;  %1414 = vmatprep.subr.mxu1 %v1915_v4 }
  0x66   : > { %1371 = vmatpush3.msra.mxu0 %v333_v24  ;;  %1415 = vmatpush3.msra.mxu1 %v2121_v25 }
  0x67   : > { %1372 = vmatprep.subr.mxu0 %v332_v26  ;;  %1416 = vmatprep.subr.mxu1 %v1915_v4 }
  0x68   : > { %1373 = vmatpush3.msra.mxu0 %v332_v26  ;;  %1417 = vmatpush3.msra.mxu1 %v2125_v27 }
  0x69   : > { %1374 = vmatprep.subr.mxu0 %v331_v28  ;;  %1418 = vmatprep.subr.mxu1 %v1915_v4 }
  0x6a   : > { %1375 = vmatpush3.msra.mxu0 %v331_v28  ;;  %1419 = vmatpush3.msra.mxu1 %v2129_v29 }
  0x6b   : > { %1376 = vmatprep.subr.mxu0 %v330_v30  ;;  %1420 = vmatprep.subr.mxu1 %v1915_v4 }
  0x6c   : > { %1377 = vmatpush3.msra.mxu0 %v330_v30  ;;  %1380 = vmatprep.mubr.f32.mxu0 %v321_v31 }
  0x6d   : > { %1378 = vmatprep.subr.mxu0 %v329_v32  ;;  %1421 = vmatpush3.msra.mxu1 %v2135_v33 }
  0x6e   : > { %1379 = vmatpush3.msra.mxu0 %v329_v32  ;;  %1422 = vmatprep.subr.mxu1 %v1915_v4 }
  0x6f   : > { %1381 = vmatmul.mubr.f32.vlgmr.msra.gmra.mxu0 %v322_v34  ;;  %1423 = vmatpush3.msra.mxu1 %v2139_v35 }
  0x70   : > { %1424 = vmatprep.mubr.msk.f32.mxu1 %vm1916_vm0, %v1915_v4  ;;  %1427 = vmatprep.subr.mxu0 %v1915_v4 }
  0x71   : > { %1425 = vmatmul.mubr.f32.vlgmr.msra.gmra.mxu1 %v473_v36  ;;  %1428 = vmatpush3.msra.mxu0 %v2078_v3 }
  0x72   : > { %1429 = vmatprep.subr.mxu0 %v1915_v4  ;;  %1462 = vmatprep.subr.mxu1 %v1915_v4 }
  0x73   : > { %1430 = vmatpush3.msra.mxu0 %v2081_v5  ;;  %1463 = vmatpush3.msra.mxu1 %v2078_v3 }
  0x74   : > { %1431 = vmatprep.subr.mxu0 %v1915_v4  ;;  %1464 = vmatprep.subr.mxu1 %v1915_v4 }
  0x75   : > { %1432 = vmatpush3.msra.mxu0 %v2085_v7  ;;  %1465 = vmatpush3.msra.mxu1 %v2081_v5 }
  0x76   : > { %1433 = vmatprep.subr.mxu0 %v1915_v4  ;;  %1466 = vmatprep.subr.mxu1 %v1915_v4 }
  0x77   : > { %1434 = vmatpush3.msra.mxu0 %v2089_v9  ;;  %1467 = vmatpush3.msra.mxu1 %v2085_v7 }
  0x78   : > { %1435 = vmatprep.subr.mxu0 %v1915_v4  ;;  %1468 = vmatprep.subr.mxu1 %v1915_v4 }
  0x79   : > { %1436 = vmatpush3.msra.mxu0 %v2093_v11  ;;  %1469 = vmatpush3.msra.mxu1 %v2089_v9 }
  0x7a   : > { %1437 = vmatprep.subr.mxu0 %v1915_v4  ;;  %1470 = vmatprep.subr.mxu1 %v1915_v4 }
  0x7b   : > { %1438 = vmatpush3.msra.mxu0 %v2097_v13  ;;  %1471 = vmatpush3.msra.mxu1 %v2093_v11 }
  0x7c   : > { %1439 = vmatprep.subr.mxu0 %v1915_v4  ;;  %1472 = vmatprep.subr.mxu1 %v1915_v4 }
  0x7d   : > { %1440 = vmatpush3.msra.mxu0 %v2101_v15  ;;  %1473 = vmatpush3.msra.mxu1 %v2097_v13 }
  0x7e   : > { %1441 = vmatprep.subr.mxu0 %v1915_v4  ;;  %1474 = vmatprep.subr.mxu1 %v1915_v4 }
  0x7f   : > { %1442 = vmatpush3.msra.mxu0 %v2105_v17  ;;  %1475 = vmatpush3.msra.mxu1 %v2101_v15 }
  0x80   : > { %1443 = vmatprep.subr.mxu0 %v1915_v4  ;;  %1476 = vmatprep.subr.mxu1 %v1915_v4 }
  0x81   : > { %1444 = vmatpush3.msra.mxu0 %v2109_v19  ;;  %1477 = vmatpush3.msra.mxu1 %v2105_v17 }
  0x82   : > { %1445 = vmatprep.subr.mxu0 %v1915_v4  ;;  %1478 = vmatprep.subr.mxu1 %v1915_v4 }
  0x83   : > { %1446 = vmatpush3.msra.mxu0 %v2113_v21  ;;  %1479 = vmatpush3.msra.mxu1 %v2109_v19 }
  0x84   : > { %1447 = vmatprep.subr.mxu0 %v1915_v4  ;;  %1480 = vmatprep.subr.mxu1 %v1915_v4 }
  0x85   : > { %1448 = vmatpush3.msra.mxu0 %v2117_v23  ;;  %1481 = vmatpush3.msra.mxu1 %v2113_v21 }
  0x86   : > { %1449 = vmatprep.subr.mxu0 %v1915_v4  ;;  %1482 = vmatprep.subr.mxu1 %v1915_v4 }
  0x87   : > { %1450 = vmatpush3.msra.mxu0 %v2121_v25  ;;  %1483 = vmatpush3.msra.mxu1 %v2117_v23 }
  0x88   : > { %1451 = vmatprep.subr.mxu0 %v1915_v4  ;;  %1484 = vmatprep.subr.mxu1 %v1915_v4 }
  0x89   : > { %1452 = vmatpush3.msra.mxu0 %v2125_v27  ;;  %1485 = vmatpush3.msra.mxu1 %v2121_v25 }
  0x8a   : > { %1453 = vmatprep.subr.mxu0 %v1915_v4  ;;  %1486 = vmatprep.subr.mxu1 %v1915_v4 }
  0x8b   : > { %1454 = vmatpush3.msra.mxu0 %v2129_v29  ;;  %1487 = vmatpush3.msra.mxu1 %v2125_v27 }
  0x8c   : > { %1455 = vmatprep.subr.mxu0 %v1915_v4  ;;  %1488 = vmatprep.subr.mxu1 %v1915_v4 }
  0x8d   : > { %1456 = vmatpush3.msra.mxu0 %v2135_v33  ;;  %1489 = vmatpush3.msra.mxu1 %v2129_v29 }
  0x8e   : > { %1457 = vmatprep.subr.mxu0 %v1915_v4  ;;  %1490 = vmatprep.subr.mxu1 %v1915_v4 }
  0x8f   : > { %1458 = vmatpush3.msra.mxu0 %v2139_v35  ;;  %1491 = vmatpush3.msra.mxu1 %v2135_v33 }
  0x90   : > { %1492 = vmatprep.subr.mxu1 %v1915_v4  ;;  %1494 = vmatprep.mubr.msk.f32.mxu1 %vm1916_vm0, %v1915_v4 }
  0x91   : > { %1493 = vmatpush3.msra.mxu1 %v2139_v35  ;;  %1497 = vmatprep.subr.mxu0 %v1915_v4 }
  0x92   : > { %1532 = vmatprep.subr.mxu1 %v1915_v4  ;;  %1383 = vmatprep.mubr.f32.mxu0 %v323_v37 }
  0x93   : > { %1384 = vmatmul.mubr.f32.gmra.mxu0 %v324_v38 }
  0x94   : > { %1386 = vmatprep.mubr.f32.mxu0 %v325_v39 }
  0x97   : > { %1387 = vmatmul.mubr.f32.gmra.mxu0 %v326_v40 }
  0x98   : > { %1389 = vmatprep.mubr.f32.mxu0 %v327_v41 }
  0x9b   : > { %1390 = vmatmul.mubr.f32.gmra.mxu0 %v328_v42 }
  0x9c   : > { %1459 = vmatprep.mubr.msk.f32.mxu0 %vm1916_vm0, %v1915_v4 }
 0x12f   : > { %v1382_v43 = vpop.f32.mrf.mxu0 }
 0x130   : > { %v424_v57 = vadd.f32 %v1382_v43, %v2225_v44 }
 0x131   : > { %v418_v45 = vpop.f32.mrf.mxu0  ;;  %v540_v46 = vpop.f32.mrf.mxu1 }
 0x132   : > { %v419_v47 = vadd.f32 %v2225_v44, %v418_v45 }
 0x133   : > { %v1426_v48 = vpop.f32.mrf.mxu1 }
 0x134   : > { %v544_v49 = vadd.f32 %v540_v46, %v419_v47 }
 0x136   : > { %1753 = vtanh.f32 %v544_v49 }
 0x143   : > { %v1754_v50 = vpop.eup %1753 }
 0x144   : > { %1460 = vmatmul.mubr.f32.vlgmr.msra.gmra.mxu0 %v1754_v50 }
 0x145   : > { %1498 = vmatpush3.msra.mxu0 %v2078_v3  ;;  %1529 = vmatprep.mubr.msk.f32.mxu0 %vm1916_vm0, %v1915_v4 }
 0x146   : > { %1499 = vmatprep.subr.mxu0 %v1915_v4 }
 0x147   : > { %1500 = vmatpush3.msra.mxu0 %v2081_v5 }
 0x148   : > { %1501 = vmatprep.subr.mxu0 %v1915_v4 }
 0x149   : > { %1502 = vmatpush3.msra.mxu0 %v2085_v7 }
 0x14a   : > { %1503 = vmatprep.subr.mxu0 %v1915_v4 }
 0x14b   : > { %1504 = vmatpush3.msra.mxu0 %v2089_v9 }
 0x14c   : > { %1505 = vmatprep.subr.mxu0 %v1915_v4 }
 0x14d   : > { %1506 = vmatpush3.msra.mxu0 %v2093_v11 }
 0x14e   : > { %1507 = vmatprep.subr.mxu0 %v1915_v4 }
 0x14f   : > { %1508 = vmatpush3.msra.mxu0 %v2097_v13 }
 0x150   : > { %1509 = vmatprep.subr.mxu0 %v1915_v4 }
 0x151   : > { %1510 = vmatpush3.msra.mxu0 %v2101_v15 }
 0x152   : > { %1511 = vmatprep.subr.mxu0 %v1915_v4 }
 0x153   : > { %1512 = vmatpush3.msra.mxu0 %v2105_v17  ;;  %v2262_v51 = vpop.f32.mrf.mxu0 }
 0x154   : > { %1513 = vmatprep.subr.mxu0 %v1915_v4  ;;  %v434_v6 = vadd.f32 %v2262_v51, %v2225_v44 }
 0x155   : > { %1514 = vmatpush3.msra.mxu0 %v2109_v19  ;;  %v428_v52 = vpop.f32.mrf.mxu0 }
 0x156   : > { %1515 = vmatprep.subr.mxu0 %v1915_v4  ;;  %v429_v62 = vadd.f32 %v2225_v44, %v428_v52 }
 0x157   : > { %1516 = vmatpush3.msra.mxu0 %v2113_v21  ;;  %v2264_v53 = vpop.f32.mrf.mxu0 }
 0x158   : > { %1517 = vmatprep.subr.mxu0 %v1915_v4 }
 0x159   : > { %1518 = vmatpush3.msra.mxu0 %v2117_v23  ;;  %v2266_v54 = vpop.f32.mrf.mxu0 }
 0x15a   : > { %1519 = vmatprep.subr.mxu0 %v1915_v4  ;;  %v439_v16 = vadd.f32 %v2225_v44, %v2266_v54 }
 0x15b   : > { %1520 = vmatpush3.msra.mxu0 %v2121_v25  ;;  %v2268_v55 = vpop.f32.mrf.mxu0 }
 0x15c   : > { %1521 = vmatprep.subr.mxu0 %v1915_v4 }
 0x15d   : > { %1522 = vmatpush3.msra.mxu0 %v2125_v27  ;;  %v2270_v56 = vpop.f32.mrf.mxu0 }
 0x15e   : > { %1523 = vmatprep.subr.mxu0 %v1915_v4 }
 0x15f   : > { %1524 = vmatpush3.msra.mxu0 %v2129_v29 }
 0x160   : > { %1525 = vmatprep.subr.mxu0 %v1915_v4 }
 0x161   : > { %1526 = vmatpush3.msra.mxu0 %v2135_v33 }
 0x162   : > { %1527 = vmatprep.subr.mxu0 %v1915_v4 }
 0x163   : > { %1528 = vmatpush3.msra.mxu0 %v2139_v35 }
 0x164   : > { %1567 = vmatprep.subr.mxu0 %v1915_v4 }
 0x204   : > { %v612_v58 = vpop.f32.mrf.mxu0 }
 0x205   : > { %v616_v59 = vadd.f32 %v612_v58, %v424_v57 }
 0x206   : > { %v1461_v60 = vpop.f32.mrf.mxu0 }
 0x207   : > { %1755 = vtanh.f32 %v616_v59 }
 0x214   : > { %v1756_v61 = vpop.eup %1755 }
 0x215   : > { %1495 = vmatmul.mubr.f32.vlgmr.msra.gmra.mxu1 %v1756_v61 }
 0x216   : > { %1533 = vmatpush3.msra.mxu1 %v2078_v3  ;;  %1564 = vmatprep.mubr.msk.f32.mxu1 %vm1916_vm0, %v1915_v4 }
 0x217   : > { %1534 = vmatprep.subr.mxu1 %v1915_v4 }
 0x218   : > { %1535 = vmatpush3.msra.mxu1 %v2081_v5 }
 0x219   : > { %1536 = vmatprep.subr.mxu1 %v1915_v4 }
 0x21a   : > { %1537 = vmatpush3.msra.mxu1 %v2085_v7 }
 0x21b   : > { %1538 = vmatprep.subr.mxu1 %v1915_v4 }
 0x21c   : > { %1539 = vmatpush3.msra.mxu1 %v2089_v9 }
 0x21d   : > { %1540 = vmatprep.subr.mxu1 %v1915_v4 }
 0x21e   : > { %1541 = vmatpush3.msra.mxu1 %v2093_v11 }
 0x21f   : > { %1542 = vmatprep.subr.mxu1 %v1915_v4 }
 0x220   : > { %1543 = vmatpush3.msra.mxu1 %v2097_v13 }
 0x221   : > { %1544 = vmatprep.subr.mxu1 %v1915_v4 }
 0x222   : > { %1545 = vmatpush3.msra.mxu1 %v2101_v15 }
 0x223   : > { %1546 = vmatprep.subr.mxu1 %v1915_v4 }
 0x224   : > { %1547 = vmatpush3.msra.mxu1 %v2105_v17 }
 0x225   : > { %1548 = vmatprep.subr.mxu1 %v1915_v4 }
 0x226   : > { %1549 = vmatpush3.msra.mxu1 %v2109_v19 }
 0x227   : > { %1550 = vmatprep.subr.mxu1 %v1915_v4 }
 0x228   : > { %1551 = vmatpush3.msra.mxu1 %v2113_v21 }
 0x229   : > { %1552 = vmatprep.subr.mxu1 %v1915_v4 }
 0x22a   : > { %1553 = vmatpush3.msra.mxu1 %v2117_v23 }
 0x22b   : > { %1554 = vmatprep.subr.mxu1 %v1915_v4 }
 0x22c   : > { %1555 = vmatpush3.msra.mxu1 %v2121_v25 }
 0x22d   : > { %1556 = vmatprep.subr.mxu1 %v1915_v4 }
 0x22e   : > { %1557 = vmatpush3.msra.mxu1 %v2125_v27 }
 0x22f   : > { %1558 = vmatprep.subr.mxu1 %v1915_v4 }
 0x230   : > { %1559 = vmatpush3.msra.mxu1 %v2129_v29 }
 0x231   : > { %1560 = vmatprep.subr.mxu1 %v1915_v4 }
 0x232   : > { %1561 = vmatpush3.msra.mxu1 %v2135_v33 }
 0x233   : > { %1562 = vmatprep.subr.mxu1 %v1915_v4 }
 0x234   : > { %1563 = vmatpush3.msra.mxu1 %v2139_v35 }
 0x235   : > { %1602 = vmatprep.subr.mxu1 %v1915_v4 }
 0x2d5   : > { %v684_v63 = vpop.f32.mrf.mxu1 }
 0x2d6   : > { %v688_v0 = vadd.f32 %v684_v63, %v429_v62 }
 0x2d7   : > { %v1496_v1 = vpop.f32.mrf.mxu1 }
 0x2d8   : > { %1757 = vtanh.f32 %v688_v0 }
 0x2e5   : > { %v1758_v2 = vpop.eup %1757 }
 0x2e6   : > { %1530 = vmatmul.mubr.f32.vlgmr.msra.gmra.mxu0 %v1758_v2 }
 0x2e7   : > { %1568 = vmatpush3.msra.mxu0 %v2078_v3  ;;  %1599 = vmatprep.mubr.msk.f32.mxu0 %vm1916_vm0, %v1915_v4 }
 0x2e8   : > { %1569 = vmatprep.subr.mxu0 %v1915_v4 }
 0x2e9   : > { %1570 = vmatpush3.msra.mxu0 %v2081_v5 }
 0x2ea   : > { %1571 = vmatprep.subr.mxu0 %v1915_v4 }
 0x2eb   : > { %1572 = vmatpush3.msra.mxu0 %v2085_v7 }
 0x2ec   : > { %1573 = vmatprep.subr.mxu0 %v1915_v4 }
 0x2ed   : > { %1574 = vmatpush3.msra.mxu0 %v2089_v9 }
 0x2ee   : > { %1575 = vmatprep.subr.mxu0 %v1915_v4 }
 0x2ef   : > { %1576 = vmatpush3.msra.mxu0 %v2093_v11 }
 0x2f0   : > { %1577 = vmatprep.subr.mxu0 %v1915_v4 }
 0x2f1   : > { %1578 = vmatpush3.msra.mxu0 %v2097_v13 }
 0x2f2   : > { %1579 = vmatprep.subr.mxu0 %v1915_v4 }
 0x2f3   : > { %1580 = vmatpush3.msra.mxu0 %v2101_v15 }
 0x2f4   : > { %1581 = vmatprep.subr.mxu0 %v1915_v4 }
 0x2f5   : > { %1582 = vmatpush3.msra.mxu0 %v2105_v17 }
 0x2f6   : > { %1583 = vmatprep.subr.mxu0 %v1915_v4 }
 0x2f7   : > { %1584 = vmatpush3.msra.mxu0 %v2109_v19 }
 0x2f8   : > { %1585 = vmatprep.subr.mxu0 %v1915_v4 }
 0x2f9   : > { %1586 = vmatpush3.msra.mxu0 %v2113_v21 }
 0x2fa   : > { %1587 = vmatprep.subr.mxu0 %v1915_v4 }
 0x2fb   : > { %1588 = vmatpush3.msra.mxu0 %v2117_v23 }
 0x2fc   : > { %1589 = vmatprep.subr.mxu0 %v1915_v4 }
 0x2fd   : > { %1590 = vmatpush3.msra.mxu0 %v2121_v25 }
 0x2fe   : > { %1591 = vmatprep.subr.mxu0 %v1915_v4 }
 0x2ff   : > { %1592 = vmatpush3.msra.mxu0 %v2125_v27 }
 0x300   : > { %1593 = vmatprep.subr.mxu0 %v1915_v4 }
 0x301   : > { %1594 = vmatpush3.msra.mxu0 %v2129_v29 }
 0x302   : > { %1595 = vmatprep.subr.mxu0 %v1915_v4 }
 0x303   : > { %1596 = vmatpush3.msra.mxu0 %v2135_v33 }
 0x304   : > { %1597 = vmatprep.subr.mxu0 %v1915_v4 }
 0x305   : > { %1598 = vmatpush3.msra.mxu0 %v2139_v35 }
 0x306   : > { %1637 = vmatprep.subr.mxu0 %v1915_v4 }
 0x3a6   : > { %v756_v8 = vpop.f32.mrf.mxu0 }
 0x3a7   : > { %v760_v10 = vadd.f32 %v756_v8, %v434_v6 }
 0x3a8   : > { %v1531_v12 = vpop.f32.mrf.mxu0 }
 0x3a9   : > { %1759 = vtanh.f32 %v760_v10 }
 0x3b6   : > { %v1760_v14 = vpop.eup %1759 }
 0x3b7   : > { %1565 = vmatmul.mubr.f32.vlgmr.msra.gmra.mxu1 %v1760_v14 }
 0x3b8   : > { %1603 = vmatpush3.msra.mxu1 %v2078_v3  ;;  %1634 = vmatprep.mubr.msk.f32.mxu1 %vm1916_vm0, %v1915_v4 }
 0x3b9   : > { %1604 = vmatprep.subr.mxu1 %v1915_v4 }
 0x3ba   : > { %1605 = vmatpush3.msra.mxu1 %v2081_v5 }
 0x3bb   : > { %1606 = vmatprep.subr.mxu1 %v1915_v4 }
 0x3bc   : > { %1607 = vmatpush3.msra.mxu1 %v2085_v7 }
 0x3bd   : > { %1608 = vmatprep.subr.mxu1 %v1915_v4 }
 0x3be   : > { %1609 = vmatpush3.msra.mxu1 %v2089_v9 }
 0x3bf   : > { %1610 = vmatprep.subr.mxu1 %v1915_v4 }
 0x3c0   : > { %1611 = vmatpush3.msra.mxu1 %v2093_v11 }
 0x3c1   : > { %1612 = vmatprep.subr.mxu1 %v1915_v4 }
 0x3c2   : > { %1613 = vmatpush3.msra.mxu1 %v2097_v13 }
 0x3c3   : > { %1614 = vmatprep.subr.mxu1 %v1915_v4 }
 0x3c4   : > { %1615 = vmatpush3.msra.mxu1 %v2101_v15 }
 0x3c5   : > { %1616 = vmatprep.subr.mxu1 %v1915_v4 }
 0x3c6   : > { %1617 = vmatpush3.msra.mxu1 %v2105_v17 }
 0x3c7   : > { %1618 = vmatprep.subr.mxu1 %v1915_v4 }
 0x3c8   : > { %1619 = vmatpush3.msra.mxu1 %v2109_v19 }
 0x3c9   : > { %1620 = vmatprep.subr.mxu1 %v1915_v4 }
 0x3ca   : > { %1621 = vmatpush3.msra.mxu1 %v2113_v21 }
 0x3cb   : > { %1622 = vmatprep.subr.mxu1 %v1915_v4 }
 0x3cc   : > { %1623 = vmatpush3.msra.mxu1 %v2117_v23 }
 0x3cd   : > { %1624 = vmatprep.subr.mxu1 %v1915_v4 }
 0x3ce   : > { %1625 = vmatpush3.msra.mxu1 %v2121_v25 }
 0x3cf   : > { %1626 = vmatprep.subr.mxu1 %v1915_v4 }
 0x3d0   : > { %1627 = vmatpush3.msra.mxu1 %v2125_v27 }
 0x3d1   : > { %1628 = vmatprep.subr.mxu1 %v1915_v4 }
 0x3d2   : > { %1629 = vmatpush3.msra.mxu1 %v2129_v29 }
 0x3d3   : > { %1630 = vmatprep.subr.mxu1 %v1915_v4 }
 0x3d4   : > { %1631 = vmatpush3.msra.mxu1 %v2135_v33 }
 0x3d5   : > { %1632 = vmatprep.subr.mxu1 %v1915_v4 }
 0x3d6   : > { %1633 = vmatpush3.msra.mxu1 %v2139_v35 }
 0x477   : > { %v828_v18 = vpop.f32.mrf.mxu1 }
 0x478   : > { %v832_v20 = vadd.f32 %v828_v18, %v439_v16 }
 0x479   : > { %v1566_v22 = vpop.f32.mrf.mxu1 }
 0x47a   : > { %1761 = vtanh.f32 %v832_v20 }
 0x487   : > { %v1762_v24 = vpop.eup %1761 }
 0x488   : > { %1600 = vmatmul.mubr.f32.vlgmr.msra.gmra.mxu0 %v1762_v24 }
 0x489   : > { %1638 = vmatpush3.msra.mxu0 %v2078_v3  ;;  %1669 = vmatprep.mubr.msk.f32.mxu0 %vm1916_vm0, %v1915_v4  ;;  %v444_v3 = vadd.f32 %v2264_v53, %v2225_v44 }
 0x48a   : > { %1639 = vmatprep.subr.mxu0 %v1915_v4 }
 0x48b   : > { %1640 = vmatpush3.msra.mxu0 %v2081_v5 }
 0x48c   : > { %1641 = vmatprep.subr.mxu0 %v1915_v4 }
 0x48d   : > { %1642 = vmatpush3.msra.mxu0 %v2085_v7 }
 0x48e   : > { %1643 = vmatprep.subr.mxu0 %v1915_v4 }
 0x48f   : > { %1644 = vmatpush3.msra.mxu0 %v2089_v9 }
 0x490   : > { %1645 = vmatprep.subr.mxu0 %v1915_v4 }
 0x491   : > { %1646 = vmatpush3.msra.mxu0 %v2093_v11 }
 0x492   : > { %1647 = vmatprep.subr.mxu0 %v1915_v4 }
 0x493   : > { %1648 = vmatpush3.msra.mxu0 %v2097_v13  ;;  %v449_v13 = vadd.f32 %v2225_v44, %v2270_v56 }
 0x494   : > { %1649 = vmatprep.subr.mxu0 %v1915_v4 }
 0x495   : > { %1650 = vmatpush3.msra.mxu0 %v2101_v15 }
 0x496   : > { %1651 = vmatprep.subr.mxu0 %v1915_v4 }
 0x497   : > { %1652 = vmatpush3.msra.mxu0 %v2105_v17 }
 0x498   : > { %1653 = vmatprep.subr.mxu0 %v1915_v4 }
 0x499   : > { %1654 = vmatpush3.msra.mxu0 %v2109_v19 }
 0x49a   : > { %1655 = vmatprep.subr.mxu0 %v1915_v4 }
 0x49b   : > { %1656 = vmatpush3.msra.mxu0 %v2113_v21 }
 0x49c   : > { %1657 = vmatprep.subr.mxu0 %v1915_v4 }
 0x49d   : > { %1658 = vmatpush3.msra.mxu0 %v2117_v23 }
 0x49e   : > { %1659 = vmatprep.subr.mxu0 %v1915_v4 }
 0x49f   : > { %1660 = vmatpush3.msra.mxu0 %v2121_v25 }
 0x4a0   : > { %1661 = vmatprep.subr.mxu0 %v1915_v4 }
 0x4a1   : > { %1662 = vmatpush3.msra.mxu0 %v2125_v27 }
 0x4a2   : > { %1663 = vmatprep.subr.mxu0 %v1915_v4 }
 0x4a3   : > { %1664 = vmatpush3.msra.mxu0 %v2129_v29 }
 0x4a4   : > { %1665 = vmatprep.subr.mxu0 %v1915_v4 }
 0x4a5   : > { %1666 = vmatpush3.msra.mxu0 %v2135_v33 }
 0x4a6   : > { %1667 = vmatprep.subr.mxu0 %v1915_v4  ;;  %v454_v4 = vadd.f32 %v2268_v55, %v2225_v44 }
 0x4a7   : > { %1668 = vmatpush3.msra.mxu0 %v2139_v35 }
 0x548   : > { %v900_v5 = vpop.f32.mrf.mxu0 }
 0x549   : > { %v904_v7 = vadd.f32 %v900_v5, %v444_v3 }
 0x54a   : > { %v1601_v9 = vpop.f32.mrf.mxu0 }
 0x54b   : > { %1763 = vtanh.f32 %v904_v7 }
 0x558   : > { %v1764_v11 = vpop.eup %1763 }
 0x559   : > { %1635 = vmatmul.mubr.f32.vlgmr.msra.gmra.mxu1 %v1764_v11 }
 0x619   : > { %v972_v15 = vpop.f32.mrf.mxu1 }
 0x61a   : > { %v976_v17 = vadd.f32 %v972_v15, %v449_v13 }
 0x61b   : > { %v1636_v19 = vpop.f32.mrf.mxu1 }
 0x61c   : > { %1765 = vtanh.f32 %v976_v17 }
 0x629   : > { %v1766_v21 = vpop.eup %1765 }
 0x62a   : > { %1670 = vmatmul.mubr.f32.vlgmr.msra.gmra.mxu0 %v1766_v21 }
 0x6ea   : > { %v1044_v23 = vpop.f32.mrf.mxu0 }
 0x6eb   : > { %v1048_v25 = vadd.f32 %v1044_v23, %v454_v4 }
 0x6ec   : > { %v1671_v26 = vpop.f32.mrf.mxu0 }
 0x6ed   : > { %1767 = vtanh.f32 %v1048_v25 }
 0x6f7   : > { %1054 = sbr.rel (%p1181_p1) target bundleno = 1964 (0x7ac), region = 64 }
 0x6fa   : > { %v1768_v27 = vpop.eup %1767 }
 0x6fb   : > { %1050 = vst [vmem:[#allocation2] sm:$0xff] %v1768_v27 }
 0x6fc   : > { %v1182_v28 = vld [vmem:[%s2447_s4] ss:$0 sm:$0xff]  ;;  %v1066_v30 = vstv %s1065_s15  ;;  %vm1074_vm1 = vcmask 7168  }
 0x6fd   : > { %v1062_v29 = vmul.f32 %v1768_v27, %v1182_v28 }
 0x6ff   : > { %1063 = vadd.xlane.f32.xlu0 %v1062_v29 }
 0x788   : > { %v1064_v31 = vpop.xlane.xlu0 %1063 }
 0x789   : > { %v1067_v32 = vadd.f32 %v1066_v30, %v1064_v31 }
 0x78b   : > { %v1183_v33 = vmul.f32 -1.442695, %v1067_v32 }
 0x78d   : > { %1769 = vpow2.f32 %v1183_v33 }
 0x79a   : > { %v1770_v34 = vpop.eup %1769 }
 0x79b   : > { %v1071_v35 = vadd.f32 1.0, %v1770_v34 }
 0x79d   : > { %1771 = vrcp.f32 %v1071_v35 }
 0x7aa   : > { %v1772_v36 = vpop.eup %1771 }
 0x7ab   : > { %1075 = vst.msk [vmem:[%s2449_s6] sm:$0xff] %vm1074_vm1, %v1772_v36 }
 0x7ac PF: > { %s21_s28 = sadd.s32 1, %s1907_s28   ;;  %s2455_s23 = smov %s1891_s24 }
 0x7ad   : > { %p18_p4 = scmp.ge.s32.totalorder %s21_s28, 4   ;;  %s2456_s24 = smov %s1895_s25 }
 0x7ae   : > { %s2457_s25 = smov %s2046_s10  ;;  %s2458_s26 = smov %s1903_s27 }
 0x7af   : > { %s2459_s27 = smov %s2461_s21  ;;  %20 = sbr.rel (!%p18_p4) target bundleno = 7 (0x7), region = 100 }
 0x7b4   :  { %1095 = vsyncpa [#allocation5], 1 }
 0x7b5   :  { %1097 = vsyncpa [#allocation5 + $0x1], 1 }
 0x7b6   :  { %1098 = vsyncpa [#allocation7], 1 }

</bundles_post_ra>
